<compile_context>
chip_gen: v5e
topology: v5e:2x2
jax: 0.10.0
libtpu: 0.0.40
codegen_flags: <defaults>
</compile_context>

<pallas_src>
import jax
import jax.numpy as jnp
from jax import lax
from jax.experimental import pallas as pl
from jax.experimental.pallas import tpu as pltpu

EPS = 1e-8  # torch.nn.functional.cosine_similarity default eps


def classifier_kernel(x_ref, w1x_ref, m_ref, b1_ref, w2_ref, b2_ref, out_ref):
    x = x_ref[...]                                      # (TB, D) f32
    w1x = w1x_ref[...]                                  # (D, H)  f32 or bf16
    m = m_ref[...]                                      # (D, H)  f32 or bf16
    w2 = w2_ref[...]                                    # (H, C)  f32 or bf16
    mm_dt = w1x.dtype                                   # MXU operand dtype

    # 1 / max(||x||, eps) == rsqrt(max(||x||^2, eps^2))  -> EUP, not VPU divide.
    sumsq = jnp.sum(x * x, axis=-1, keepdims=True)      # (TB, 1)
    xn = x * lax.rsqrt(jnp.maximum(sumsq, EPS * EPS))   # x / max(||x||, eps)

    # layer1 entirely on the MXU:
    #   concat(x, sims) @ W1 + b1 == x @ W1x + xn @ M + b1,  M = emb_n^T @ W1s
    h = (jnp.dot(x.astype(mm_dt), w1x, preferred_element_type=jnp.float32)
         + jnp.dot(xn.astype(mm_dt), m, preferred_element_type=jnp.float32)
         + b1_ref[...])                                 # (TB, H)
    h = jnp.maximum(h, 0.0)                             # ReLU

    # layer2; C == full array last dim, so this block is legal (masked store,
    # but 8x less HBM writeback than lane-padding C up to 128).
    out = (jnp.dot(h.astype(mm_dt), w2, preferred_element_type=jnp.float32)
           + b2_ref[...])                               # (TB, C)
    out_ref[...] = out.astype(out_ref.dtype)


def prepare_params(class_embs, w1, b1, w2, b2, matmul_dtype=jnp.float32):
    """One-time weight preprocessing (hoisted out of the forward path)."""
    D = class_embs.shape[1]
    H = w1.shape[1]
    C = w2.shape[1]

    ce = class_embs.astype(jnp.float32)                          # (3, D)
    e_norm = jnp.sqrt(jnp.sum(ce * ce, axis=-1, keepdims=True))  # (3, 1)
    emb_n = ce / jnp.maximum(e_norm, EPS)                        # (3, D)

    w1x = w1[:D, :].astype(jnp.float32)                          # (D, H)
    w1s = w1[D:, :].astype(jnp.float32)                          # (3, H)
    m = emb_n.T @ w1s                                            # (D, H)

    return dict(
        w1x=w1x.astype(matmul_dtype),
        m=m.astype(matmul_dtype),
        b1=b1.reshape(1, H).astype(jnp.float32),
        w2=w2.astype(matmul_dtype),
        b2=b2.reshape(1, C).astype(jnp.float32),
    )


def _round_up(n, m):
    return ((n + m - 1) // m) * m


def _batch_tiling(B):
    """Pick (TILE_B, B_pad): TILE_B multiple of 8 sublanes."""
    B8 = _round_up(B, 8)
    if B8 <= 1024:
        tile = B8            # single grid step; overhead irrelevant at this size
    else:
        # Large batch: big tiles amortize the ~0.35us/grid-step overhead, but
        # keep >=2 steps so the "parallel" axis can shard across v7x's 2 TCs.
        nsteps = max(2, pl.cdiv(B8, 2048))
        tile = _round_up(pl.cdiv(B8, nsteps), 8)
    b_pad = _round_up(B8, tile)
    return tile, b_pad


def classifier_forward(x, params):
    """x: (B, D) f32; params from prepare_params(). Returns (B, C) f32 logits."""
    B, D = x.shape
    w1x, m, b1, w2, b2 = (params["w1x"], params["m"], params["b1"],
                          params["w2"], params["b2"])
    H = w1x.shape[1]
    C = w2.shape[1]

    TILE_B, B_pad = _batch_tiling(B)
    xp = x.astype(jnp.float32)
    if B_pad != B:
        # Zero pad rows: sumsq=0 -> inv=1/eps, but xn = 0 * (1/eps) = 0, benign.
        xp = jnp.pad(xp, ((0, B_pad - B), (0, 0)))

    const = lambda shape: pl.BlockSpec(shape, lambda i: (0,) * len(shape))

    out = pl.pallas_call(
        classifier_kernel,
        out_shape=jax.ShapeDtypeStruct((B_pad, C), jnp.float32),
        grid=(B_pad // TILE_B,),
        in_specs=[
            pl.BlockSpec((TILE_B, D), lambda i: (i, 0)),  # x (batch-tiled)
            const((D, H)),                                # W1_x
            const((D, H)),                                # M = emb_n^T @ W1_s
            const((1, H)),                                # b1
            const((H, C)),                                # W2
            const((1, C)),                                # b2
        ],
        out_specs=pl.BlockSpec((TILE_B, C), lambda i: (i, 0)),
        compiler_params=pltpu.CompilerParams(
            dimension_semantics=("parallel",)),
    )(xp, w1x, m, b1, w2, b2)

    return out[:B] if B_pad != B else out


def reference_forward(x, class_embs, w1, b1, w2, b2):
    """Pure-JAX reference mirroring the PyTorch forward."""
    def cos(a, b):
        num = jnp.sum(a * b, axis=-1)
        den = (jnp.maximum(jnp.linalg.norm(a, axis=-1), EPS)
               * jnp.maximum(jnp.linalg.norm(b, axis=-1), EPS))
        return num / den

    s1 = cos(x, class_embs[0:1]).reshape(-1, 1)
    s2 = cos(x, class_embs[1:2]).reshape(-1, 1)
    s3 = cos(x, class_embs[2:3]).reshape(-1, 1)
    xc = jnp.concatenate([x, s1, s2, s3], axis=1)
    h = jax.nn.relu(xc @ w1 + b1)
    return h @ w2 + b2


if __name__ == "__main__":
    B = 8              # batch
    D = 32             # embedding_dim
    H = 512            # layer1 hidden (fixed by the module)
    C = 16             # num_classes

    key = jax.random.PRNGKey(0)
    kx, ke, kw1, kb1, kw2, kb2 = jax.random.split(key, 6)

    x = jax.random.normal(kx, (B, D), dtype=jnp.float32)
    class_embs = jax.random.normal(ke, (3, D), dtype=jnp.float32)

    lim1 = 1.0 / jnp.sqrt(D + 3.0)
    w1 = jax.random.uniform(kw1, (D + 3, H), jnp.float32, -lim1, lim1)
    b1 = jax.random.uniform(kb1, (H,), jnp.float32, -lim1, lim1)
    lim2 = 1.0 / jnp.sqrt(float(H))
    w2 = jax.random.uniform(kw2, (H, C), jnp.float32, -lim2, lim2)
    b2 = jax.random.uniform(kb2, (C,), jnp.float32, -lim2, lim2)

    ref = reference_forward(x, class_embs, w1, b1, w2, b2)

    # f32-operand MXU path: exact vs. reference at 1e-4.
    params_f32 = prepare_params(class_embs, w1, b1, w2, b2, jnp.float32)
    out = jax.block_until_ready(classifier_forward(x, params_f32))
    assert out.shape == (B, C)
    assert jnp.allclose(out, ref, atol=1e-4, rtol=1e-4), "f32 mismatch vs reference"

    # bf16-operand MXU path (f32 accumulation) for v5e/v6e/v7x throughput;
    # looser tolerance accounts for bf16 operand rounding.
    params_bf16 = prepare_params(class_embs, w1, b1, w2, b2, jnp.bfloat16)
    out_bf16 = jax.block_until_ready(classifier_forward(x, params_bf16))
    assert jnp.allclose(out_bf16, ref, atol=1e-1, rtol=1e-1), "bf16 mismatch vs reference"

    print("KERNEL_OK")
</pallas_src>

<mosaic_0001>
module attributes {stable_mosaic.version = 11 : i64} {
  func.func @classifier_kernel(%arg0: i32, %arg1: memref<8x32xf32, #tpu.memory_space<vmem>>, %arg2: memref<32x512xf32, #tpu.memory_space<vmem>>, %arg3: memref<32x512xf32, #tpu.memory_space<vmem>>, %arg4: memref<1x512xf32, #tpu.memory_space<vmem>>, %arg5: memref<512x16xf32, #tpu.memory_space<vmem>>, %arg6: memref<1x16xf32, #tpu.memory_space<vmem>>, %arg7: memref<8x16xf32, #tpu.memory_space<vmem>>) attributes {dimension_semantics = [#tpu.dimension_semantics<parallel>], iteration_bounds = array<i64: 1>, scalar_prefetch = 0 : i64, scratch_operands = 0 : i64, tpu.core_type = #tpu.core_type<tc>, window_params = [{transform_indices = @transform_0, window_bounds = array<i64: 8, 32>}, {pipeline_mode = #tpu.pipeline_mode<synchronous>, transform_indices = @transform_1, window_bounds = array<i64: 32, 512>}, {pipeline_mode = #tpu.pipeline_mode<synchronous>, transform_indices = @transform_2, window_bounds = array<i64: 32, 512>}, {pipeline_mode = #tpu.pipeline_mode<synchronous>, transform_indices = @transform_3, window_bounds = array<i64: 1, 512>}, {pipeline_mode = #tpu.pipeline_mode<synchronous>, transform_indices = @transform_4, window_bounds = array<i64: 512, 16>}, {pipeline_mode = #tpu.pipeline_mode<synchronous>, transform_indices = @transform_5, window_bounds = array<i64: 1, 16>}, {transform_indices = @transform_6, window_bounds = array<i64: 8, 16>}]} {
    %c0 = arith.constant 0 : index
    %c0_0 = arith.constant 0 : index
    %0 = vector.load %arg1[%c0, %c0_0] : memref<8x32xf32, #tpu.memory_space<vmem>>, vector<8x32xf32>
    %c0_1 = arith.constant 0 : index
    %c0_2 = arith.constant 0 : index
    %1 = vector.load %arg2[%c0_1, %c0_2] : memref<32x512xf32, #tpu.memory_space<vmem>>, vector<32x512xf32>
    %c0_3 = arith.constant 0 : index
    %c0_4 = arith.constant 0 : index
    %2 = vector.load %arg3[%c0_3, %c0_4] : memref<32x512xf32, #tpu.memory_space<vmem>>, vector<32x512xf32>
    %c0_5 = arith.constant 0 : index
    %c0_6 = arith.constant 0 : index
    %3 = vector.load %arg5[%c0_5, %c0_6] : memref<512x16xf32, #tpu.memory_space<vmem>>, vector<512x16xf32>
    %4 = arith.mulf %0, %0 : vector<8x32xf32>
    %cst = arith.constant dense<0.000000e+00> : vector<8xf32>
    %5 = vector.multi_reduction <add>, %4, %cst [1] : vector<8x32xf32> to vector<8xf32>
    %6 = vector.shape_cast %5 : vector<8xf32> to vector<8x1xf32>
    %cst_7 = arith.constant 1.000000e-16 : f32
    %7 = vector.broadcast %cst_7 : f32 to vector<8x1xf32>
    %8 = arith.maximumf %6, %7 : vector<8x1xf32>
    %9 = math.rsqrt %8 : vector<8x1xf32>
    %10 = vector.broadcast %9 : vector<8x1xf32> to vector<8x32xf32>
    %11 = arith.mulf %0, %10 : vector<8x32xf32>
    %cst_8 = arith.constant dense<0.000000e+00> : vector<8x512xf32>
    %12 = tpu.matmul %0, %1, %cst_8 {dimension_numbers = #tpu.dot_dimension_numbers<[1], [0], [0], [1], [0, 0, 1, 1], [], []>} : vector<8x32xf32>, vector<32x512xf32>, vector<8x512xf32> -> vector<8x512xf32>
    %cst_9 = arith.constant dense<0.000000e+00> : vector<8x512xf32>
    %13 = tpu.matmul %11, %2, %cst_9 {dimension_numbers = #tpu.dot_dimension_numbers<[1], [0], [0], [1], [0, 0, 1, 1], [], []>} : vector<8x32xf32>, vector<32x512xf32>, vector<8x512xf32> -> vector<8x512xf32>
    %14 = arith.addf %12, %13 : vector<8x512xf32>
    %c0_10 = arith.constant 0 : index
    %c0_11 = arith.constant 0 : index
    %15 = vector.load %arg4[%c0_10, %c0_11] : memref<1x512xf32, #tpu.memory_space<vmem>>, vector<1x512xf32>
    %16 = vector.broadcast %15 : vector<1x512xf32> to vector<8x512xf32>
    %17 = arith.addf %14, %16 : vector<8x512xf32>
    %cst_12 = arith.constant 0.000000e+00 : f32
    %18 = vector.broadcast %cst_12 : f32 to vector<8x512xf32>
    %19 = arith.maximumf %17, %18 : vector<8x512xf32>
    %cst_13 = arith.constant dense<0.000000e+00> : vector<8x16xf32>
    %20 = tpu.matmul %19, %3, %cst_13 {dimension_numbers = #tpu.dot_dimension_numbers<[1], [0], [0], [1], [0, 0, 1, 1], [], []>} : vector<8x512xf32>, vector<512x16xf32>, vector<8x16xf32> -> vector<8x16xf32>
    %c0_14 = arith.constant 0 : index
    %c0_15 = arith.constant 0 : index
    %21 = vector.load %arg6[%c0_14, %c0_15] : memref<1x16xf32, #tpu.memory_space<vmem>>, vector<1x16xf32>
    %22 = vector.broadcast %21 : vector<1x16xf32> to vector<8x16xf32>
    %23 = arith.addf %20, %22 : vector<8x16xf32>
    %c0_16 = arith.constant 0 : index
    %c0_17 = arith.constant 0 : index
    %24 = vector.load %arg7[%c0_16, %c0_17] : memref<8x16xf32, #tpu.memory_space<vmem>>, vector<8x16xf32>
    tpu.vector_store %arg7[%c0_16, %c0_17], %23 {strides = array<i32>} : memref<8x16xf32, #tpu.memory_space<vmem>>, vector<8x16xf32>,
    return
  }
  func.func @transform_0(%arg0: i32) -> (i32, i32) {
    %c0_i32 = arith.constant 0 : i32
    %c0_i32_0 = arith.constant 0 : i32
    return %arg0, %c0_i32 : i32, i32
  }
  func.func @transform_1(%arg0: i32) -> (i32, i32) {
    %c0_i32 = arith.constant 0 : i32
    %c0_i32_0 = arith.constant 0 : i32
    %c0_i32_1 = arith.constant 0 : i32
    return %c0_i32, %c0_i32_0 : i32, i32
  }
  func.func @transform_2(%arg0: i32) -> (i32, i32) {
    %c0_i32 = arith.constant 0 : i32
    %c0_i32_0 = arith.constant 0 : i32
    %c0_i32_1 = arith.constant 0 : i32
    return %c0_i32, %c0_i32_0 : i32, i32
  }
  func.func @transform_3(%arg0: i32) -> (i32, i32) {
    %c0_i32 = arith.constant 0 : i32
    %c0_i32_0 = arith.constant 0 : i32
    %c0_i32_1 = arith.constant 0 : i32
    return %c0_i32, %c0_i32_0 : i32, i32
  }
  func.func @transform_4(%arg0: i32) -> (i32, i32) {
    %c0_i32 = arith.constant 0 : i32
    %c0_i32_0 = arith.constant 0 : i32
    %c0_i32_1 = arith.constant 0 : i32
    return %c0_i32, %c0_i32_0 : i32, i32
  }
  func.func @transform_5(%arg0: i32) -> (i32, i32) {
    %c0_i32 = arith.constant 0 : i32
    %c0_i32_0 = arith.constant 0 : i32
    %c0_i32_1 = arith.constant 0 : i32
    return %c0_i32, %c0_i32_0 : i32, i32
  }
  func.func @transform_6(%arg0: i32) -> (i32, i32) {
    %c0_i32 = arith.constant 0 : i32
    %c0_i32_0 = arith.constant 0 : i32
    return %arg0, %c0_i32 : i32, i32
  }
}

</mosaic_0001>

<bundles_post_ra>
// kernel: tpu_custom_call.1
= control target key start
LH: loop header
LB: loop body
LE: loop exit
PB: predicated region body
PF: predicated region fallthrough
CT: control target
= control target key end

     0   :  { %vm122_vm0 = vcmask 261120   ;;  %s816_s0 = inlined_call_operand.vmem [shape: f32[8,32], index: 0, kind: input, shape index: {}]   ;;  %s817_s1 = inlined_call_operand.vmem [shape: f32[32,512], index: 1, kind: input, shape index: {}]   ;;  %s818_s2 = inlined_call_operand.vmem [shape: f32[32,512], index: 2, kind: input, shape index: {}]   ;;  %s819_s3 = inlined_call_operand.vmem [shape: f32[1,512], index: 3, kind: input, shape index: {}]   ;;  %s820_s4 = inlined_call_operand.vmem [shape: f32[512,16], index: 4, kind: input, shape index: {}]   ;;  %s821_s5 = inlined_call_operand.vmem [shape: f32[1,16], index: 5, kind: input, shape index: {}]   ;;  %s822_s6 = inlined_call_operand.hbm [shape: f32[8,16], index: 6, kind: output, shape index: {}]  }
   0x1   :  { %v501_v0 = vld [vmem:[%s816_s0] sm:$0xff] }
   0x2   :  { %11 = vsyncpa [#allocation3], 0  ;;  %v121_v1 = vmul.f32 %v501_v0, %v501_v0  ;;  %v53_v3 = vld [vmem:[%s818_s2 + $0x60] sm:$0xff]  ;;  %v54_v4 = vld [vmem:[%s818_s2 + $0x68] sm:$0xff]  ;;  %s462_s30 = smov [#allocation2]   ;;  %s415_s10 = sshll.u32 %s822_s6, 4  ;;  %s416_s10 = int_to_ptr.hbm [resolvable:$true] %s415_s10 }
   0x3   :  { %v55_v5 = vld [vmem:[%s818_s2 + $0x70] sm:$0xff]  ;;  %153 = vmatpush.msra.mxu0 %v53_v3  ;;  %173 = vmatpush.msra.mxu1 %v54_v4  ;;  %v56_v6 = vld [vmem:[%s818_s2 + $0x78] sm:$0xff]  ;;  %v49_v7 = vld [vmem:[%s818_s2 + $0x40] sm:$0xff]  ;;  %s413_s7 = sshll.u32 %s462_s30, 4  ;;  %vm406_vm4 = vcmask 130048   ;;  %s414_s7 = int_to_ptr.vmem [resolvable:$true] %s413_s7 }
   0x4   :  { %v123_v2 = vsel %vm122_vm0, %v121_v1, 0.0  ;;  %193 = vmatpush.msra.mxu2 %v55_v5  ;;  %213 = vmatpush.msra.mxu3 %v56_v6  ;;  %v50_v8 = vld [vmem:[%s818_s2 + $0x48] sm:$0xff]  ;;  %v51_v9 = vld [vmem:[%s818_s2 + $0x50] sm:$0xff]  ;;  %v52_v10 = vld [vmem:[%s818_s2 + $0x58] sm:$0xff] }
   0x5   :  { %124 = vadd.xlane.f32.xlu0 %v123_v2  ;;  %154 = vmatpush.msra.mxu0 %v49_v7  ;;  %v45_v11 = vld [vmem:[%s818_s2 + $0x20] sm:$0xff]  ;;  %v46_v12 = vld [vmem:[%s818_s2 + $0x28] sm:$0xff]  ;;  %v47_v13 = vld [vmem:[%s818_s2 + $0x30] sm:$0xff] }
   0x6   :  { %174 = vmatpush.msra.mxu1 %v50_v8  ;;  %194 = vmatpush.msra.mxu2 %v51_v9  ;;  %v48_v14 = vld [vmem:[%s818_s2 + $0x38] sm:$0xff]  ;;  %v41_v15 = vld [vmem:[%s818_s2] sm:$0xff]  ;;  %v42_v16 = vld [vmem:[%s818_s2 + $0x8] sm:$0xff] }
   0x7   :  { %214 = vmatpush.msra.mxu3 %v52_v10  ;;  %155 = vmatpush.msra.mxu0 %v45_v11  ;;  %v43_v17 = vld [vmem:[%s818_s2 + $0x10] sm:$0xff]  ;;  %v44_v18 = vld [vmem:[%s818_s2 + $0x18] sm:$0xff]  ;;  %v37_v20 = vld [vmem:[%s817_s1 + $0x60] sm:$0xff] }
   0x8   :  { %175 = vmatpush.msra.mxu1 %v46_v12  ;;  %195 = vmatpush.msra.mxu2 %v47_v13  ;;  %v39_v19 = vld [vmem:[%s817_s1 + $0x70] sm:$0xff]  ;;  %v38_v21 = vld [vmem:[%s817_s1 + $0x68] sm:$0xff]  ;;  %v40_v22 = vld [vmem:[%s817_s1 + $0x78] sm:$0xff] }
   0x9   :  { %215 = vmatpush.msra.mxu3 %v48_v14  ;;  %156 = vmatpush.msra.mxu0 %v41_v15  ;;  %v35_v23 = vld [vmem:[%s817_s1 + $0x50] sm:$0xff]  ;;  %v33_v24 = vld [vmem:[%s817_s1 + $0x40] sm:$0xff]  ;;  %v34_v25 = vld [vmem:[%s817_s1 + $0x48] sm:$0xff] }
   0xa   :  { %176 = vmatpush.msra.mxu1 %v42_v16  ;;  %196 = vmatpush.msra.mxu2 %v43_v17  ;;  %v36_v26 = vld [vmem:[%s817_s1 + $0x58] sm:$0xff]  ;;  %v31_v27 = vld [vmem:[%s817_s1 + $0x30] sm:$0xff]  ;;  %v29_v28 = vld [vmem:[%s817_s1 + $0x20] sm:$0xff] }
   0xb   :  { %216 = vmatpush.msra.mxu3 %v44_v18  ;;  %236 = vmatpush.msrb.mxu0 %v37_v20  ;;  %v30_v29 = vld [vmem:[%s817_s1 + $0x28] sm:$0xff]  ;;  %v32_v30 = vld [vmem:[%s817_s1 + $0x38] sm:$0xff]  ;;  %v27_v31 = vld [vmem:[%s817_s1 + $0x10] sm:$0xff] }
   0xc   :  { %276 = vmatpush.msrb.mxu2 %v39_v19  ;;  %256 = vmatpush.msrb.mxu1 %v38_v21  ;;  %v25_v32 = vld [vmem:[%s817_s1] sm:$0xff]  ;;  %v26_v33 = vld [vmem:[%s817_s1 + $0x8] sm:$0xff]  ;;  %v28_v34 = vld [vmem:[%s817_s1 + $0x18] sm:$0xff] }
   0xd   :  { %296 = vmatpush.msrb.mxu3 %v40_v22  ;;  %237 = vmatpush.msrb.mxu0 %v33_v24  ;;  %v72_v45 = vld [vmem:[%s820_s4 + $0x78] sm:$0xff]  ;;  %v71_v49 = vld [vmem:[%s820_s4 + $0x70] sm:$0xff]  ;;  %v70_v53 = vld [vmem:[%s820_s4 + $0x68] sm:$0xff] }
   0xe   :  { %277 = vmatpush.msrb.mxu2 %v35_v23  ;;  %257 = vmatpush.msrb.mxu1 %v34_v25  ;;  %v88_v46 = vld [vmem:[%s820_s4 + $0xf8] sm:$0xff]  ;;  %v87_v50 = vld [vmem:[%s820_s4 + $0xf0] sm:$0xff]  ;;  %v86_v54 = vld [vmem:[%s820_s4 + $0xe8] sm:$0xff] }
   0xf   :  { %297 = vmatpush.msrb.mxu3 %v36_v26  ;;  %238 = vmatpush.msrb.mxu0 %v29_v28  ;;  %v104_v47 = vld [vmem:[%s820_s4 + $0x178] sm:$0xff]  ;;  %v103_v51 = vld [vmem:[%s820_s4 + $0x170] sm:$0xff]  ;;  %v102_v55 = vld [vmem:[%s820_s4 + $0x168] sm:$0xff] }
  0x10   :  { %278 = vmatpush.msrb.mxu2 %v31_v27  ;;  %258 = vmatpush.msrb.mxu1 %v30_v29  ;;  %v120_v48 = vld [vmem:[%s820_s4 + $0x1f8] sm:$0xff]  ;;  %v119_v52 = vld [vmem:[%s820_s4 + $0x1f0] sm:$0xff]  ;;  %v118_v56 = vld [vmem:[%s820_s4 + $0x1e8] sm:$0xff] }
  0x11   :  { %298 = vmatpush.msrb.mxu3 %v32_v30  ;;  %239 = vmatpush.msrb.mxu0 %v25_v32  ;;  %v69_v57 = vld [vmem:[%s820_s4 + $0x60] sm:$0xff]  ;;  %v68_v61 = vld [vmem:[%s820_s4 + $0x58] sm:$0xff]  ;;  %v83_v2 = vld [vmem:[%s820_s4 + $0xd0] sm:$0xff] }
  0x12   :  { %279 = vmatpush.msrb.mxu2 %v27_v31  ;;  %259 = vmatpush.msrb.mxu1 %v26_v33  ;;  %v85_v58 = vld [vmem:[%s820_s4 + $0xe0] sm:$0xff]  ;;  %v84_v62 = vld [vmem:[%s820_s4 + $0xd8] sm:$0xff]  ;;  %v66_v3 = vld [vmem:[%s820_s4 + $0x48] sm:$0xff] }
  0x13   :  { %299 = vmatpush.msrb.mxu3 %v28_v34  ;;  %v101_v59 = vld [vmem:[%s820_s4 + $0x160] sm:$0xff]  ;;  %v100_v63 = vld [vmem:[%s820_s4 + $0x158] sm:$0xff]  ;;  %v82_v4 = vld [vmem:[%s820_s4 + $0xc8] sm:$0xff] }
  0x14   :  { %v117_v60 = vld [vmem:[%s820_s4 + $0x1e0] sm:$0xff]  ;;  %v116_v1 = vld [vmem:[%s820_s4 + $0x1d8] sm:$0xff]  ;;  %v99_v9 = vld [vmem:[%s820_s4 + $0x150] sm:$0xff] }
  0x15   :  { %v65_v5 = vld [vmem:[%s820_s4 + $0x40] sm:$0xff]  ;;  %v64_v7 = vld [vmem:[%s820_s4 + $0x38] sm:$0xff]  ;;  %v115_v10 = vld [vmem:[%s820_s4 + $0x1d0] sm:$0xff] }
  0x16   :  { %v81_v6 = vld [vmem:[%s820_s4 + $0xc0] sm:$0xff]  ;;  %v80_v8 = vld [vmem:[%s820_s4 + $0xb8] sm:$0xff]  ;;  %v63_v11 = vld [vmem:[%s820_s4 + $0x30] sm:$0xff] }
  0x17   :  { %v79_v12 = vld [vmem:[%s820_s4 + $0xb0] sm:$0xff]  ;;  %v98_v13 = vld [vmem:[%s820_s4 + $0x148] sm:$0xff]  ;;  %v97_v17 = vld [vmem:[%s820_s4 + $0x140] sm:$0xff] }
  0x18   :  { %v114_v14 = vld [vmem:[%s820_s4 + $0x1c8] sm:$0xff]  ;;  %v113_v18 = vld [vmem:[%s820_s4 + $0x1c0] sm:$0xff]  ;;  %v96_v21 = vld [vmem:[%s820_s4 + $0x138] sm:$0xff] }
  0x19   :  { %v62_v15 = vld [vmem:[%s820_s4 + $0x28] sm:$0xff]  ;;  %v61_v19 = vld [vmem:[%s820_s4 + $0x20] sm:$0xff]  ;;  %v112_v22 = vld [vmem:[%s820_s4 + $0x1b8] sm:$0xff] }
  0x1a   :  { %v78_v16 = vld [vmem:[%s820_s4 + $0xa8] sm:$0xff]  ;;  %v77_v20 = vld [vmem:[%s820_s4 + $0xa0] sm:$0xff]  ;;  %v60_v23 = vld [vmem:[%s820_s4 + $0x18] sm:$0xff] }
  0x1b   :  { %v76_v24 = vld [vmem:[%s820_s4 + $0x98] sm:$0xff]  ;;  %v95_v25 = vld [vmem:[%s820_s4 + $0x130] sm:$0xff]  ;;  %v94_v29 = vld [vmem:[%s820_s4 + $0x128] sm:$0xff] }
  0x1c   :  { %v111_v26 = vld [vmem:[%s820_s4 + $0x1b0] sm:$0xff]  ;;  %v110_v30 = vld [vmem:[%s820_s4 + $0x1a8] sm:$0xff]  ;;  %v93_v33 = vld [vmem:[%s820_s4 + $0x120] sm:$0xff] }
  0x1d   :  { %v59_v27 = vld [vmem:[%s820_s4 + $0x10] sm:$0xff]  ;;  %v58_v31 = vld [vmem:[%s820_s4 + $0x8] sm:$0xff]  ;;  %v109_v34 = vld [vmem:[%s820_s4 + $0x1a0] sm:$0xff] }
  0x1e   :  { %v75_v28 = vld [vmem:[%s820_s4 + $0x90] sm:$0xff]  ;;  %v74_v32 = vld [vmem:[%s820_s4 + $0x88] sm:$0xff] }
  0x78   :  { %v125_v35 = vpop.xlane.xlu0 %124 }
  0x79   :  { %v126_v36 = vmax.f32 %v125_v35, 1e-16  ;;  %v57_v35 = vld [vmem:[%s820_s4] sm:$0xff] }
  0x7b   :  { %434 = vrsqrt.f32 %v126_v36  ;;  %vm133_vm2 = vweird.f32 %v126_v36 }
  0x81   :  { %v435_v37 = vpop.eup %434 }
  0x82   :  { %v128_v38 = vmul.f32 %v435_v37, %v126_v36  ;;  %vm134_vm1 = vweird.f32 %v435_v37  ;;  %v73_v36 = vld [vmem:[%s820_s4 + $0x80] sm:$0xff] }
  0x83   :  { %vm135_vm3 = vmor %vm133_vm2, %vm134_vm1 }
  0x84   :  { %v129_v39 = vmul.f32 %v435_v37, %v128_v38  ;;  %v108_v38 = vld [vmem:[%s820_s4 + $0x198] sm:$0xff] }
  0x86   :  { %v130_v40 = vmul.f32 0.5, %v129_v39  ;;  %v91_v39 = vld [vmem:[%s820_s4 + $0x110] sm:$0xff] }
  0x88   :  { %v131_v41 = vsub.f32 1.5, %v130_v40  ;;  %v107_v40 = vld [vmem:[%s820_s4 + $0x190] sm:$0xff] }
  0x8a   :  { %v132_v42 = vmul.f32 %v435_v37, %v131_v41  ;;  %v90_v41 = vld [vmem:[%s820_s4 + $0x108] sm:$0xff] }
  0x8c   :  { %v136_v43 = vsel %vm135_vm3, %v435_v37, %v132_v42  ;;  %v92_v37 = vld [vmem:[%s820_s4 + $0x118] sm:$0xff]  ;;  %v106_v42 = vld [vmem:[%s820_s4 + $0x188] sm:$0xff] }
  0x8d   :  { %v137_v44 = vmul.f32 %v136_v43, %v501_v0  ;;  %v89_v43 = vld [vmem:[%s820_s4 + $0x100] sm:$0xff] }
  0x8f   :  { %424 = vmatmul.msk.f32.vlgmr.msra.gmra.mxu0 %vm122_vm0, %v137_v44  ;;  %425 = vmatmul.msk.f32.vlgmr.msra.gmra.mxu1 %vm122_vm0, %v137_v44 }
  0x90   :  { %426 = vmatmul.msk.f32.vlgmr.msra.gmra.mxu2 %vm122_vm0, %v137_v44  ;;  %427 = vmatmul.msk.f32.vlgmr.msra.gmra.mxu3 %vm122_vm0, %v137_v44  ;;  %v105_v44 = vld [vmem:[%s820_s4 + $0x180] sm:$0xff] }
  0x91   :  { %326 = vmatpush.msra.mxu0 %v72_v45  ;;  %346 = vmatpush.msra.mxu1 %v88_v46 }
  0x92   :  { %366 = vmatpush.msra.mxu2 %v104_v47  ;;  %386 = vmatpush.msra.mxu3 %v120_v48  ;;  %v304_v47 = vld [vmem:[%s819_s3] sm:$0xf] }
  0x93   :  { %327 = vmatpush.msra.mxu0 %v71_v49  ;;  %347 = vmatpush.msra.mxu1 %v87_v50  ;;  %v306_v50 = vperm.slane %v304_v47, 0 }
  0x94   :  { %367 = vmatpush.msra.mxu2 %v103_v51  ;;  %387 = vmatpush.msra.mxu3 %v119_v52  ;;  %v307_v51 = vperm.slane %v304_v47, 1 }
  0x95   :  { %328 = vmatpush.msra.mxu0 %v70_v53  ;;  %348 = vmatpush.msra.mxu1 %v86_v54 }
  0x96   :  { %368 = vmatpush.msra.mxu2 %v102_v55  ;;  %388 = vmatpush.msra.mxu3 %v118_v56 }
  0x97   :  { %428 = vmatmul.msk.f32.vlgmr.msrb.gmra.mxu0 %vm122_vm0, %v501_v0  ;;  %429 = vmatmul.msk.f32.vlgmr.msrb.gmra.mxu1 %vm122_vm0, %v501_v0 }
  0x98   :  { %430 = vmatmul.msk.f32.vlgmr.msrb.gmra.mxu2 %vm122_vm0, %v501_v0  ;;  %431 = vmatmul.msk.f32.vlgmr.msrb.gmra.mxu3 %vm122_vm0, %v501_v0  ;;  %v67_v0 = vld [vmem:[%s820_s4 + $0x50] sm:$0xff] }
  0x99   :  { %329 = vmatpush.msra.mxu0 %v69_v57  ;;  %349 = vmatpush.msra.mxu1 %v85_v58 }
  0x9a   :  { %369 = vmatpush.msra.mxu2 %v101_v59  ;;  %389 = vmatpush.msra.mxu3 %v117_v60  ;;  %v308_v60 = vperm.slane %v304_v47, 2 }
  0x9b   :  { %330 = vmatpush.msra.mxu0 %v68_v61  ;;  %350 = vmatpush.msra.mxu1 %v84_v62  ;;  %v309_v61 = vperm.slane %v304_v47, 3 }
  0x9c   :  { %370 = vmatpush.msra.mxu2 %v100_v63  ;;  %390 = vmatpush.msra.mxu3 %v116_v1 }
  0x9d   :  { %331 = vmatpush.msra.mxu0 %v67_v0  ;;  %351 = vmatpush.msra.mxu1 %v83_v2 }
  0x9e   :  { %371 = vmatpush.msra.mxu2 %v99_v9  ;;  %391 = vmatpush.msra.mxu3 %v115_v10 }
  0x9f   :  { %332 = vmatpush.msra.mxu0 %v66_v3  ;;  %352 = vmatpush.msra.mxu1 %v82_v4 }
  0xa0   :  { %372 = vmatpush.msra.mxu2 %v98_v13  ;;  %392 = vmatpush.msra.mxu3 %v114_v14 }
  0xa1   :  { %333 = vmatpush.msra.mxu0 %v65_v5  ;;  %353 = vmatpush.msra.mxu1 %v81_v6  ;;  %v433_v6 = vld [vmem:[%s821_s5] ss:$0 sm:$0xff] }
  0xa2   :  { %373 = vmatpush.msra.mxu2 %v97_v17  ;;  %393 = vmatpush.msra.mxu3 %v113_v18 }
  0xa3   :  { %334 = vmatpush.msra.mxu0 %v64_v7  ;;  %354 = vmatpush.msra.mxu1 %v80_v8 }
  0xa4   :  { %374 = vmatpush.msra.mxu2 %v96_v21  ;;  %394 = vmatpush.msra.mxu3 %v112_v22 }
  0xa5   :  { %335 = vmatpush.msra.mxu0 %v63_v11  ;;  %355 = vmatpush.msra.mxu1 %v79_v12 }
  0xa6   :  { %375 = vmatpush.msra.mxu2 %v95_v25  ;;  %395 = vmatpush.msra.mxu3 %v111_v26 }
  0xa7   :  { %336 = vmatpush.msra.mxu0 %v62_v15  ;;  %356 = vmatpush.msra.mxu1 %v78_v16 }
  0xa8   :  { %376 = vmatpush.msra.mxu2 %v94_v29  ;;  %396 = vmatpush.msra.mxu3 %v110_v30 }
  0xa9   :  { %337 = vmatpush.msra.mxu0 %v61_v19  ;;  %357 = vmatpush.msra.mxu1 %v77_v20 }
  0xaa   :  { %377 = vmatpush.msra.mxu2 %v93_v33  ;;  %397 = vmatpush.msra.mxu3 %v109_v34 }
  0xab   :  { %338 = vmatpush.msra.mxu0 %v60_v23  ;;  %358 = vmatpush.msra.mxu1 %v76_v24 }
  0xac   :  { %378 = vmatpush.msra.mxu2 %v92_v37  ;;  %398 = vmatpush.msra.mxu3 %v108_v38 }
  0xad   :  { %339 = vmatpush.msra.mxu0 %v59_v27  ;;  %359 = vmatpush.msra.mxu1 %v75_v28 }
  0xae   :  { %379 = vmatpush.msra.mxu2 %v91_v39  ;;  %399 = vmatpush.msra.mxu3 %v107_v40 }
  0xaf   :  { %340 = vmatpush.msra.mxu0 %v58_v31  ;;  %360 = vmatpush.msra.mxu1 %v74_v32 }
  0xb0   :  { %380 = vmatpush.msra.mxu2 %v90_v41  ;;  %400 = vmatpush.msra.mxu3 %v106_v42 }
  0xb1   :  { %341 = vmatpush.msra.mxu0 %v57_v35  ;;  %361 = vmatpush.msra.mxu1 %v73_v36 }
  0xb2   :  { %381 = vmatpush.msra.mxu2 %v89_v43  ;;  %401 = vmatpush.msra.mxu3 %v105_v44 }
 0x10c   :  { %v158_v45 = vpop.f32.mrf.mxu0  ;;  %v178_v46 = vpop.f32.mrf.mxu1 }
 0x113   :  { %v198_v48 = vpop.f32.mrf.mxu2  ;;  %v218_v49 = vpop.f32.mrf.mxu3 }
 0x114   :  { %v241_v52 = vpop.f32.mrf.mxu0  ;;  %v261_v53 = vpop.f32.mrf.mxu1 }
 0x115   :  { %v242_v54 = vadd.f32 %v241_v52, %v158_v45  ;;  %v262_v55 = vadd.f32 %v261_v53, %v178_v46 }
 0x117   :  { %v314_v56 = vadd.f32 %v306_v50, %v242_v54  ;;  %v315_v57 = vadd.f32 %v307_v51, %v262_v55 }
 0x119   :  { %v318_v58 = vmax.f32 %v314_v56, 0.0  ;;  %v319_v59 = vmax.f32 %v315_v57, 0.0 }
 0x11b   :  { %v281_v62 = vpop.f32.mrf.mxu2  ;;  %v301_v63 = vpop.f32.mrf.mxu3  ;;  %342 = vmatmul.f32.vlgmr.msra.gmra.mxu0 %v318_v58  ;;  %362 = vmatmul.f32.vlgmr.msra.gmra.mxu1 %v319_v59 }
 0x11c   :  { %v282_v1 = vadd.f32 %v281_v62, %v198_v48  ;;  %v302_v0 = vadd.f32 %v301_v63, %v218_v49 }
 0x11e   :  { %v316_v2 = vadd.f32 %v308_v60, %v282_v1  ;;  %v317_v3 = vadd.f32 %v309_v61, %v302_v0 }
 0x120   :  { %v320_v4 = vmax.f32 %v316_v2, 0.0  ;;  %v321_v5 = vmax.f32 %v317_v3, 0.0 }
 0x122   :  { %382 = vmatmul.f32.vlgmr.msra.gmra.mxu2 %v320_v4  ;;  %402 = vmatmul.f32.vlgmr.msra.gmra.mxu3 %v321_v5 }
 0x198   :  { %v343_v7 = vpop.f32.mrf.mxu0  ;;  %v363_v9 = vpop.f32.mrf.mxu1 }
 0x199   :  { %v344_v8 = vadd.f32 %v433_v6, %v343_v7 }
 0x19b   :  { %v364_v10 = vadd.f32 %v363_v9, %v344_v8 }
 0x1a5   :  { %v383_v11 = vpop.f32.mrf.mxu2  ;;  %v403_v13 = vpop.f32.mrf.mxu3 }
 0x1a6   :  { %v384_v12 = vadd.f32 %v383_v11, %v364_v10 }
 0x1a8   :  { %v404_v14 = vadd.f32 %v403_v13, %v384_v12 }
 0x1aa   :  { %407 = vst.msk [vmem:[#allocation2] sm:$0xff] %vm406_vm4, %v404_v14 }
 0x1ab   :  { %418 = dma.vmem_to_hbm [thread:$0]  %s414_s7, 128, %s416_s10, [#allocation3]  }
 0x1ac   :  { %460 = dma.done.wait [#allocation3], 128  }
 0x1ad   :  { %461 = vsyncadd [#allocation3], 4294967168 }
 0x1ae   :  { %423 = vsyncpa [#allocation3], 1 }

</bundles_post_ra>
